<compile_context>
chip_gen: v7x
topology: tpu7x:2x2x1
jax: 0.10.0
libtpu: 0.0.40
codegen_flags: <defaults>
</compile_context>

<pallas_src>
import math

import jax
import jax.numpy as jnp
from jax import lax
from jax.experimental import pallas as pl
from jax.experimental.pallas import tpu as pltpu


def _round_up(x: int, m: int) -> int:
    return ((x + m - 1) // m) * m


def _edge_expansion_kernel(x_ref, g_ref, m_ref, o_ref):
    # x_ref: (TR, k*3)    k fused edge vectors per lane-row
    # g_ref: (k*3, k*3)   0/1 block-diagonal group-sum matrix
    # m_ref: (k*3, k*CD)  block-diagonal normalize->linear matrix (weights folded)
    # o_ref: (TR, k*CD)   lane-dense output slab
    x = x_ref[...].astype(jnp.float32)
    sq = x * x
    # Per-lane sum of squares of the lane's own 3-vector group (MXU, f32-exact path).
    ss = jnp.dot(sq, g_ref[...], preferred_element_type=jnp.float32,
                 precision=lax.Precision.HIGHEST)
    # eps added to the norm (not the squared norm), matching the reference.
    inv = pl.reciprocal(jnp.sqrt(ss) + 1e-7, approx=False)
    vn = x * inv
    # Broadcast over C and scale by W in one MXU matmul; streams straight into stores.
    out = jnp.dot(vn, m_ref[...], preferred_element_type=jnp.float32,
                  precision=lax.Precision.HIGHEST)
    o_ref[...] = out.astype(o_ref.dtype)


def edge_expansion(edge_vector: jax.Array, weight: jax.Array, *,
                   tile_n: int | None = None, min_n_for_pallas: int = 2048):
    """EdgeExpansion forward.

    edge_vector: (N, 3) edge vectors.
    weight:      (C,) or (C, 1) -- the nn.Linear(1, C, bias=False) weight.
    Returns:     (N, C, 3), matching the PyTorch module.
    """
    N, D = edge_vector.shape
    if D != 3:
        raise ValueError("edge_vector must have shape (N, 3)")
    w = weight.reshape(-1).astype(jnp.float32)
    C = w.shape[0]
    CD = C * D
    out_dtype = edge_vector.dtype

    if N == 0:
        return jnp.zeros((0, C, D), out_dtype)

    # Small-N fallback: the XLA-fused path beats kernel launch + per-step overhead.
    if N < min_n_for_pallas:
        x32 = edge_vector.astype(jnp.float32)
        nrm = jnp.sqrt(jnp.sum(x32 * x32, axis=1, keepdims=True))
        vn = x32 / (nrm + 1e-7)
        return (vn[:, None, :] * w[None, :, None]).astype(out_dtype)

    itemsize = jnp.dtype(out_dtype).itemsize
    sub = max(8, 32 // itemsize)            # sublane multiple: 8 (f32), 16 (bf16), 32 (i8)

    # Row-fusion factor making the output slab lane-dense (k*CD % 128 == 0).
    k = 128 // math.gcd(CD, 128)
    if N % k != 0:
        k = 1                               # unfused fallback; tail handled by block masking
    Nf = N // k
    row_unit = sub * k                      # tile_n granularity in original edges

    # Generation-aware budgets.
    try:
        vmem_cap = int(getattr(pltpu.get_tpu_info(), "vmem_capacity_bytes", 64 << 20))
    except Exception:
        vmem_cap = 64 << 20
    big_vmem = vmem_cap >= (96 << 20)       # v5e / v6e (128 MiB) vs v7x (64 MiB)
    max_scoped = (48 << 20) if big_vmem else (32 << 20)
    row_cap = 16384 if big_vmem else 8192   # max original edges per grid step

    lanes_in = _round_up(k * D, 128)        # VMEM lane padding of the input block
    lanes_out = _round_up(k * CD, 128)
    bytes_per_frow = (lanes_in + lanes_out) * itemsize

    if tile_n is None:
        per_buf_budget = (max_scoped - (6 << 20)) // 2            # double-buffered in+out
        rows_by_vmem = max(sub, (per_buf_budget // bytes_per_frow) // sub * sub) * k
        tile_n = min(row_cap, rows_by_vmem)
        # Keep the "parallel" axis at >= 2 steps so both v7x TensorCores get work.
        tile_n = min(tile_n, _round_up(-(-N // 2), row_unit))
    tile_n = max(row_unit, (int(tile_n) // row_unit) * row_unit)
    tile_rows = tile_n // k

    grid = (pl.cdiv(Nf, tile_rows),)

    # Free row-major reshape into the fused layout.
    x2 = edge_vector.reshape(Nf, k * D)

    # M[r*3+d, r*CD + c*3+d'] = W[c] * (d == d');  G[r*3+d, s*3+e] = (r == s).
    eye_k = jnp.eye(k, dtype=jnp.float32)
    g_mat = jnp.kron(eye_k, jnp.ones((D, D), jnp.float32))                # (k*3, k*3)
    m_single = jnp.kron(w.reshape(1, C), jnp.eye(D, dtype=jnp.float32))   # (3, C*3)
    m_block = jnp.kron(eye_k, m_single)                                   # (k*3, k*C*3)

    # Explicit scoped-VMEM budget: lane-padded, double-buffered blocks + headroom.
    blk_in = tile_rows * lanes_in * itemsize
    blk_out = tile_rows * lanes_out * itemsize
    blk_mats = (_round_up(k * D, 8) * _round_up(k * D, 128)
                + _round_up(k * D, 8) * lanes_out) * 4
    vmem_limit = min(max(2 * (blk_in + blk_out + blk_mats) + (4 << 20), 16 << 20),
                     max_scoped)

    cost = pl.CostEstimate(
        flops=int(N * (6 * D + 2 * D * D + 2 * D * CD)),
        transcendentals=int(2 * N * D),
        bytes_accessed=int(N * D * itemsize + N * CD * itemsize
                           + (g_mat.size + m_block.size) * 4),
    )

    out2d = pl.pallas_call(
        _edge_expansion_kernel,
        out_shape=jax.ShapeDtypeStruct((Nf, k * CD), out_dtype),
        grid_spec=pltpu.PrefetchScalarGridSpec(
            num_scalar_prefetch=0,
            grid=grid,
            in_specs=[
                pl.BlockSpec((tile_rows, k * D), lambda i: (i, 0)),
                pl.BlockSpec((k * D, k * D), lambda i: (0, 0)),     # resident G
                pl.BlockSpec((k * D, k * CD), lambda i: (0, 0)),    # resident M
            ],
            out_specs=pl.BlockSpec((tile_rows, k * CD), lambda i: (i, 0)),
        ),
        compiler_params=pltpu.CompilerParams(
            dimension_semantics=("parallel",),
            vmem_limit_bytes=int(vmem_limit),
        ),
        cost_estimate=cost,
    )(x2, g_mat, m_block)

    # (N/k, k*C*3) -> (N, C, 3) is the identical row-major order: free reshape.
    return out2d.reshape(N, C, D)


if __name__ == "__main__":
    key = jax.random.PRNGKey(0)
    k_v, k_w = jax.random.split(key)

    N = 600             # small; multiple of k=4 so the fused lane-dense path is exercised
    edge_channels = 32  # C  (C*3 = 96 -> fused to 384 = 3*128 lanes)

    edge_vector = jax.random.normal(k_v, (N, 3), dtype=jnp.float32)
    # nn.Linear(1, C, bias=False).weight has shape (C, 1).
    weight = jax.random.uniform(k_w, (edge_channels, 1), dtype=jnp.float32,
                                minval=-1.0, maxval=1.0)

    # Force the Pallas path (small N would normally take the XLA fallback) and use a
    # small tile so the grid has several steps including a masked partial tail block.
    out = edge_expansion(edge_vector, weight, tile_n=256, min_n_for_pallas=0)
    out = jax.block_until_ready(out)

    # Pure-JAX reference for a correctness sanity check.
    norm = jnp.linalg.norm(edge_vector, axis=1, keepdims=True)
    vn = edge_vector / (norm + 1e-7)
    ref = vn[:, None, :] * weight.reshape(-1)[None, :, None]   # (N, C, 3)

    assert out.shape == (N, edge_channels, 3)
    assert jnp.allclose(out, ref, atol=1e-5, rtol=1e-5), float(jnp.max(jnp.abs(out - ref)))
    print("KERNEL_OK")
</pallas_src>

<mosaic_0001>
module attributes {stable_mosaic.version = 11 : i64} {
  func.func @_edge_expansion_kernel(%arg0: i32, %arg1: memref<64x12xf32, #tpu.memory_space<vmem>>, %arg2: memref<12x12xf32, #tpu.memory_space<vmem>>, %arg3: memref<12x384xf32, #tpu.memory_space<vmem>>, %arg4: memref<64x384xf32, #tpu.memory_space<vmem>>) attributes {dimension_semantics = [#tpu.dimension_semantics<parallel>], iteration_bounds = array<i64: 3>, scalar_prefetch = 0 : i64, scratch_operands = 0 : i64, tpu.core_type = #tpu.core_type<tc>, window_params = [{transform_indices = @transform_0, window_bounds = array<i64: 64, 12>}, {pipeline_mode = #tpu.pipeline_mode<synchronous>, transform_indices = @transform_1, window_bounds = array<i64: 12, 12>}, {pipeline_mode = #tpu.pipeline_mode<synchronous>, transform_indices = @transform_2, window_bounds = array<i64: 12, 384>}, {transform_indices = @transform_3, window_bounds = array<i64: 64, 384>}]} {
    %c0 = arith.constant 0 : index
    %c0_0 = arith.constant 0 : index
    %0 = vector.load %arg1[%c0, %c0_0] : memref<64x12xf32, #tpu.memory_space<vmem>>, vector<64x12xf32>
    %1 = arith.mulf %0, %0 : vector<64x12xf32>
    %c0_1 = arith.constant 0 : index
    %c0_2 = arith.constant 0 : index
    %2 = vector.load %arg2[%c0_1, %c0_2] : memref<12x12xf32, #tpu.memory_space<vmem>>, vector<12x12xf32>
    %cst = arith.constant dense<0.000000e+00> : vector<64x12xf32>
    %3 = tpu.matmul %1, %2, %cst {dimension_numbers = #tpu.dot_dimension_numbers<[1], [0], [0], [1], [0, 0, 1, 1], [], []>, precision = #tpu.contract_precision<fp32>} : vector<64x12xf32>, vector<12x12xf32>, vector<64x12xf32> -> vector<64x12xf32>
    %4 = math.sqrt %3 : vector<64x12xf32>
    %cst_3 = arith.constant 1.000000e-07 : f32
    %5 = vector.broadcast %cst_3 : f32 to vector<64x12xf32>
    %6 = arith.addf %4, %5 : vector<64x12xf32>
    %7 = tpu.reciprocal %6 : vector<64x12xf32> -> vector<64x12xf32>
    %8 = arith.mulf %0, %7 : vector<64x12xf32>
    %c0_4 = arith.constant 0 : index
    %c0_5 = arith.constant 0 : index
    %9 = vector.load %arg3[%c0_4, %c0_5] : memref<12x384xf32, #tpu.memory_space<vmem>>, vector<12x384xf32>
    %cst_6 = arith.constant dense<0.000000e+00> : vector<64x384xf32>
    %10 = tpu.matmul %8, %9, %cst_6 {dimension_numbers = #tpu.dot_dimension_numbers<[1], [0], [0], [1], [0, 0, 1, 1], [], []>, precision = #tpu.contract_precision<fp32>} : vector<64x12xf32>, vector<12x384xf32>, vector<64x384xf32> -> vector<64x384xf32>
    %c0_7 = arith.constant 0 : index
    %c0_8 = arith.constant 0 : index
    %11 = vector.load %arg4[%c0_7, %c0_8] : memref<64x384xf32, #tpu.memory_space<vmem>>, vector<64x384xf32>
    tpu.vector_store %arg4[%c0_7, %c0_8], %10 {strides = array<i32>} : memref<64x384xf32, #tpu.memory_space<vmem>>, vector<64x384xf32>,
    return
  }
  func.func @transform_0(%arg0: i32) -> (i32, i32) {
    %c0_i32 = arith.constant 0 : i32
    %c0_i32_0 = arith.constant 0 : i32
    return %arg0, %c0_i32 : i32, i32
  }
  func.func @transform_1(%arg0: i32) -> (i32, i32) {
    %c0_i32 = arith.constant 0 : i32
    %c0_i32_0 = arith.constant 0 : i32
    %c0_i32_1 = arith.constant 0 : i32
    return %c0_i32, %c0_i32_0 : i32, i32
  }
  func.func @transform_2(%arg0: i32) -> (i32, i32) {
    %c0_i32 = arith.constant 0 : i32
    %c0_i32_0 = arith.constant 0 : i32
    %c0_i32_1 = arith.constant 0 : i32
    return %c0_i32, %c0_i32_0 : i32, i32
  }
  func.func @transform_3(%arg0: i32) -> (i32, i32) {
    %c0_i32 = arith.constant 0 : i32
    %c0_i32_0 = arith.constant 0 : i32
    return %arg0, %c0_i32 : i32, i32
  }
}

</mosaic_0001>

<bundles_post_ra>
// kernel: tpu_custom_call.1
= control target key start
LH: loop header
LB: loop body
LE: loop exit
PB: predicated region body
PF: predicated region fallthrough
CT: control target
= control target key end

     0   :  { %8 = vsyncpa [#allocation3], 0  ;;  %s4198_s0 = inlined_call_operand.vmem [shape: f32[150,12], index: 0, kind: input, shape index: {}]   ;;  %s4199_s1 = inlined_call_operand.vmem [shape: f32[12,12], index: 1, kind: input, shape index: {}]   ;;  %s4200_s2 = inlined_call_operand.vmem [shape: f32[12,384], index: 2, kind: input, shape index: {}]   ;;  %s4201_s3 = inlined_call_operand.hbm [shape: f32[150,384], index: 3, kind: output, shape index: {}]  }
   0x1   :  { %10 = vsyncpa [#allocation3 + $0x1], 0  ;;  %s3547_s12 = smov 0   ;;  %s3549_s13 = smov 0  }
   0x2   :  { %s3551_s14 = smov 0   ;;  %s3553_s15 = smov 0  }
   0x3 LB: > { %s3568_s16 = sadd.s32 4294967295, %s3521_s15   ;;  %s2825_s17 = sadd.s32 4294967294, %s3521_s15   ;;  %s3521_s15 = sphi %s3553_s15, %s4207_s15   ;;  %s3517_s14 = sphi %s3551_s14, %s4206_s14   ;;  %s3513_s13 = sphi %s3549_s13, %s4205_s13   ;;  %s3509_s12 = sphi %s3547_s12, %s4204_s12  }
   0x4   : > { %s3572_s18 = sadd.s32 1, %s3521_s15   ;;  %s91_s19 = sadd.s32 1, %s3517_s14 }
   0x5   : > { %s88_s20 = ssub.s32 %s3521_s15, %s3572_s18  ;;  %p101_p0 = scmp.ne.s32.totalorder %s3517_s14, %s3513_s13 }
   0x6   : > { %p89_p1 = scmp.eq.s32.totalorder %s88_s20, 0  ;;  %p102_p2 = scmp.eq.s32.totalorder %s3568_s16, 2 }
   0x7   : > { %p107_p3 = scmp.ne.s32.totalorder %s3513_s13, %s3509_s12  ;;  %p108_p4 = scmp.eq.s32.totalorder %s2825_s17, 2 }
   0x8   : > { %s3583_s21 = scalar_select %p89_p1, %s3517_s14, %s91_s19  }
   0x9   : > { %p3585_p5 = por %p102_p2, %p101_p0  ;;  %p3589_p6 = por %p108_p4, %p107_p3 }
   0xa   : > { %p2828_p7 = scmp.ge.s32.totalorder %s3521_s15, 1  ;;  %p149_p8 = scmp.lt.s32.totalorder %s3521_s15, 4 }
   0xc   : > { %p150_p9 = pnand %p2828_p7, %p149_p8 }
   0xd   : > { %v213_v0 = vld [vmem:[%s4199_s1] sm:$0xff] (!%p150_p9)  ;;  %v214_v1 = vld [vmem:[%s4199_s1 + $0x8] sm:$0xf] (!%p150_p9)  ;;  %vm240_vm0 = vcmask (!%p150_p9), 1043456   ;;  %s3602_s28 = sshll.u32 (!%p150_p9), %s3568_s16, 3  ;;  %vm215_vm1 = vcmask (!%p150_p9), 97280  }
   0xe   : > { %153 = sbr.rel (%p150_p9) target bundleno = 805 (0x325), region = 32  ;;  %v242_v2 = vsel (!%p150_p9), %vm240_vm0, %v214_v1, 0  ;;  %v245_v3 = vand.u32 (!%p150_p9), 4294901760, %v213_v0  ;;  %p182_p10 = scmp.lt.s32.totalorder (!%p150_p9), %s3602_s28, 18 }
   0xf   : > { %v248_v4 = vand.u32 (!%p150_p9), 4294901760, %v242_v2 }
  0x10   : > { %v3607_v5 = vsub.f32 (!%p150_p9), %v213_v0, %v245_v3 }
  0x11   : > { %v3609_v6 = vpack.c.bf16 (!%p150_p9), %v248_v4, %v245_v3  ;;  %v3611_v7 = vsub.f32 (!%p150_p9), %v242_v2, %v248_v4 }
  0x12   : > { %v394_v8 = vand.u32 (!%p150_p9), 4294901760, %v3607_v5 }
  0x13   : > { %3153 = vmatprep.subr.bf16.mxu0 (!%p150_p9), %v3609_v6  ;;  %v401_v9 = vand.u32 (!%p150_p9), 4294901760, %v3611_v7 }
  0x14   : > { %3155 = vmatpush3.bf16.msra.mxu0 (!%p150_p9), %v3609_v6  ;;  %v395_v11 = vsub.f32 (!%p150_p9), %v3607_v5, %v394_v8 }
  0x15   : > { %s183_s29 = scalar_select %p182_p10, %s3602_s28, 18  ;;  %v402_v15 = vsub.f32 %v3611_v7, %v401_v9 }
  0x16   : > { %v396_v21 = vand.u32 4294901760, %v395_v11  ;;  %v3160_v11 = vpack.c.bf16 %v3611_v7, %v3607_v5  ;;  %v1085_v5 = vld [vmem:[%s4200_s2 + $0x8] sm:$0xff]  ;;  %v1084_v7 = vld [vmem:[%s4200_s2] sm:$0xff] }
  0x17   : > { %s2830_s30 = sshll.u32 %s183_s29, 3  ;;  %v403_v26 = vand.u32 4294901760, %v402_v15  ;;  %s174_s29 = sand.u32 1, %s3513_s13  }
  0x18   : > { %s185_s6 = scalar_lea.vmem %s4198_s0, %s2830_s30  ;;  %s3384_s30 = smul.u32 192, %s174_s29 }
  0x19   : > { %v3620_v10 = vld [vmem:[%s185_s6] sm:$0xff]  ;;  %v3625_v12 = vld [vmem:[%s185_s6 + $0x8] sm:$0xff]  ;;  %v3627_v13 = vld [vmem:[%s185_s6 + $0x10] sm:$0xff]  ;;  %v3156_v35 = vpack.c.bf16 %v403_v26, %v396_v21  ;;  %s4137_s5 = scalar_lea.sflag [#allocation3], %s174_s29 }
  0x1a   : > { %v205_v14 = vmul.f32 %v3620_v10, %v3620_v10  ;;  %v206_v16 = vmul.f32 %v3625_v12, %v3625_v12  ;;  %v207_v17 = vmul.f32 %v3627_v13, %v3627_v13  ;;  %v3638_v18 = vld [vmem:[%s185_s6 + $0x18] sm:$0xff]  ;;  %v3640_v19 = vld [vmem:[%s185_s6 + $0x20] sm:$0xff]  ;;  %v3642_v20 = vld [vmem:[%s185_s6 + $0x28] sm:$0xff]  ;;  %s4109_s4 = scalar_lea.vmem [#allocation2], %s3384_s30 }
  0x1b   : > { %v208_v22 = vmul.f32 %v3638_v18, %v3638_v18  ;;  %v209_v23 = vmul.f32 %v3640_v19, %v3640_v19  ;;  %v210_v24 = vmul.f32 %v3642_v20, %v3642_v20  ;;  %v3660_v33 = vld [vmem:[%s185_s6 + $0x30] sm:$0xff]  ;;  %v3662_v34 = vld [vmem:[%s185_s6 + $0x38] sm:$0xff]  ;;  %3157 = vmatprep.subr.bf16.mxu0 %v3156_v35  ;;  %s2750_s6 = ssub.s32 (%p3585_p5), 19, %s3602_s28 }
  0x1c   : > { %v217_v25 = vsel %vm215_vm1, %v205_v14, 0  ;;  %v220_v27 = vsel %vm215_vm1, %v206_v16, 0  ;;  %v223_v28 = vsel %vm215_vm1, %v207_v17, 0  ;;  %v211_v45 = vmul.f32 %v3660_v33, %v3660_v33  ;;  %p2751_p11 = scmp.lt.s32.totalorder (%p3585_p5), %s2750_s6, 8 }
  0x1d   : > { %v3653_v29 = vand.u32 4294901760, %v217_v25  ;;  %v3655_v30 = vand.u32 4294901760, %v220_v27  ;;  %v3657_v31 = vand.u32 4294901760, %v223_v28  ;;  %v226_v32 = vsel %vm215_vm1, %v208_v22, 0 }
  0x1e   : > { %v3664_v36 = vand.u32 4294901760, %v226_v32  ;;  %v229_v37 = vsel %vm215_vm1, %v209_v23, 0  ;;  %v232_v38 = vsel %vm215_vm1, %v210_v24, 0  ;;  %v212_v46 = vmul.f32 %v3662_v34, %v3662_v34 }
  0x1f   : > { %v3669_v39 = vsub.f32 %v217_v25, %v3653_v29  ;;  %v3672_v40 = vsub.f32 %v220_v27, %v3655_v30  ;;  %v3675_v41 = vsub.f32 %v223_v28, %v3657_v31  ;;  %v3677_v42 = vand.u32 4294901760, %v229_v37  ;;  %v1087_v28 = vld [vmem:[%s4200_s2 + $0x18] sm:$0xf] }
  0x20   : > { %v3680_v43 = vsub.f32 %v226_v32, %v3664_v36  ;;  %v3682_v44 = vand.u32 4294901760, %v232_v38  ;;  %v235_v53 = vsel %vm215_vm1, %v211_v45, 0  ;;  %v238_v54 = vsel %vm215_vm1, %v212_v46, 0 }
  0x21   : > { %v313_v47 = vand.u32 4294901760, %v3669_v39  ;;  %v323_v48 = vand.u32 4294901760, %v3672_v40  ;;  %v333_v49 = vand.u32 4294901760, %v3675_v41  ;;  %v3692_v50 = vsub.f32 %v229_v37, %v3677_v42 }
  0x22   : > { %v343_v51 = vand.u32 4294901760, %v3680_v43  ;;  %v3696_v52 = vsub.f32 %v232_v38, %v3682_v44  ;;  %v3714_v61 = vand.u32 4294901760, %v235_v53  ;;  %v3716_v62 = vand.u32 4294901760, %v238_v54 }
  0x23   : > { %v314_v55 = vsub.f32 %v3669_v39, %v313_v47  ;;  %v324_v56 = vsub.f32 %v3672_v40, %v323_v48  ;;  %v334_v57 = vsub.f32 %v3675_v41, %v333_v49  ;;  %v353_v58 = vand.u32 4294901760, %v3692_v50 }
  0x24   : > { %v344_v59 = vsub.f32 %v3680_v43, %v343_v51  ;;  %v363_v60 = vand.u32 4294901760, %v3696_v52  ;;  %v372_v3 = vsub.f32 %v235_v53, %v3714_v61  ;;  %v382_v4 = vsub.f32 %v238_v54, %v3716_v62 }
  0x25   : > { %v315_v63 = vand.u32 4294901760, %v314_v55  ;;  %v325_v0 = vand.u32 4294901760, %v324_v56  ;;  %v335_v1 = vand.u32 4294901760, %v334_v57  ;;  %v354_v2 = vsub.f32 %v3692_v50, %v353_v58 }
  0x26   : > { %v345_v14 = vand.u32 4294901760, %v344_v59  ;;  %v364_v15 = vsub.f32 %v3696_v52, %v363_v60  ;;  %v373_v16 = vand.u32 4294901760, %v372_v3  ;;  %v383_v17 = vand.u32 4294901760, %v382_v4 }
  0x27   : > { %2964 = vmatprep.mubr.f32.mxu0 %v315_v63  ;;  %v355_v21 = vand.u32 4294901760, %v354_v2  ;;  %v3168_v27 = vpack.c.bf16 %v401_v9, %v394_v8  ;;  %v1123_v9 = vand.u32 4294901760, %v1085_v5 }
  0x28   : > { %2965 = vmatmul.mubr.f32.vlgmr.msra.gmra.mrb[0].mxu0 %v325_v0  ;;  %v374_v22 = vsub.f32 %v372_v3, %v373_v16  ;;  %v365_v23 = vand.u32 4294901760, %v364_v15  ;;  %v384_v24 = vsub.f32 %v382_v4, %v383_v17 }
  0x29   : > { %3159 = vmatpush3.bf16.msra.mxu0 %v3156_v35  ;;  %2967 = vmatprep.mubr.f32.mxu0 %v335_v1  ;;  %v1115_v35 = vsel %vm240_vm0, %v1087_v28, 0  ;;  %v3791_v38 = vsub.f32 %v1085_v5, %v1123_v9 }
  0x2a   : > { %3161 = vmatprep.subr.bf16.mxu0 %v3160_v11  ;;  %v375_v25 = vand.u32 4294901760, %v374_v22  ;;  %v385_v26 = vand.u32 4294901760, %v384_v24 }
  0x2c   : > { %2968 = vmatmul.mubr.f32.gmra.mrb[2].mxu0 %v345_v14 }
  0x2d   : > { %2970 = vmatprep.mubr.f32.mxu0 %v355_v21 }
  0x30   : > { %2971 = vmatmul.mubr.f32.gmra.mrb[4].mxu0 %v365_v23 }
  0x31   : > { %2973 = vmatprep.mubr.f32.mxu0 %v375_v25 }
  0x34   : > { %2974 = vmatmul.mubr.f32.gmra.mrb[6].mxu0 %v385_v26 }
  0x35   : > { %2980 = vmatprep.mubr.f32.mxu0 %v3653_v29 }
  0x38   : > { %2981 = vmatmul.mubr.f32.vlgmr.msra.gmra.mrb[0].mxu0 %v3655_v30 }
  0x39   : > { %3163 = vmatpush3.bf16.msra.mxu0 %v3160_v11  ;;  %2983 = vmatprep.mubr.f32.mxu0 %v3657_v31 }
  0x3a   : > { %3165 = vmatprep.subr.bf16.mxu0 %v3609_v6 }
  0x3c   : > { %2984 = vmatmul.mubr.f32.gmra.mrb[2].mxu0 %v3664_v36 }
  0x3d   : > { %2986 = vmatprep.mubr.f32.mxu0 %v3677_v42 }
  0x40   : > { %2987 = vmatmul.mubr.f32.gmra.mrb[4].mxu0 %v3682_v44 }
  0x41   : > { %2989 = vmatprep.mubr.f32.mxu0 %v3714_v61 }
  0x44   : > { %2990 = vmatmul.mubr.f32.gmra.mrb[6].mxu0 %v3716_v62 }
  0x45   : > { %2996 = vmatprep.mubr.f32.mxu0 %v3669_v39  ;;  %v1129_v39 = vand.u32 4294901760, %v1115_v35 }
  0x47   : > { %v3802_v46 = vsub.f32 %v1115_v35, %v1129_v39 }
  0x48   : > { %2997 = vmatmul.mubr.f32.vlgmr.msra.gmra.mrb[0].mxu0 %v3672_v40 }
  0x49   : > { %3167 = vmatpush3.bf16.msra.mxu0 %v3609_v6  ;;  %2999 = vmatprep.mubr.f32.mxu0 %v3675_v41  ;;  %v1300_v56 = vand.u32 4294901760, %v3802_v46 }
  0x4a   : > { %3169 = vmatprep.subr.bf16.mxu0 %v3168_v27 }
  0x4c   : > { %3000 = vmatmul.mubr.f32.gmra.mrb[2].mxu0 %v3680_v43 }
  0x4d   : > { %3002 = vmatprep.mubr.f32.mxu0 %v3692_v50 }
  0x50   : > { %3003 = vmatmul.mubr.f32.gmra.mrb[4].mxu0 %v3696_v52 }
  0x51   : > { %3005 = vmatprep.mubr.f32.mxu0 %v372_v3 }
  0x54   : > { %3006 = vmatmul.mubr.f32.gmra.mrb[6].mxu0 %v382_v4 }
  0x55   : > { %3012 = vmatprep.mubr.f32.mxu0 %v313_v47  ;;  %v1282_v47 = vand.u32 4294901760, %v3791_v38 }
  0x57   : > { %v1283_v50 = vsub.f32 %v3791_v38, %v1282_v47 }
  0x58   : > { %3013 = vmatmul.mubr.f32.vlgmr.msra.gmra.mrb[0].mxu0 %v323_v48 }
  0x59   : > { %3171 = vmatpush3.bf16.msra.mxu0 %v3168_v27  ;;  %3015 = vmatprep.mubr.f32.mxu0 %v333_v49  ;;  %v1284_v52 = vand.u32 4294901760, %v1283_v50 }
  0x5a   : > { %3173 = vmatprep.subr.bf16.mxu0 %v3609_v6 }
  0x5c   : > { %3016 = vmatmul.mubr.f32.gmra.mrb[2].mxu0 %v343_v51 }
  0x5d   : > { %3018 = vmatprep.mubr.f32.mxu0 %v353_v58  ;;  %v1301_v58 = vsub.f32 %v3802_v46, %v1300_v56 }
  0x60   : > { %3019 = vmatmul.mubr.f32.gmra.mrb[4].mxu0 %v363_v60  ;;  %v1302_v60 = vand.u32 4294901760, %v1301_v58 }
  0x61   : > { %3021 = vmatprep.mubr.f32.mxu0 %v373_v16 }
  0x64   : > { %3022 = vmatmul.mubr.f32.gmra.mrb[6].mxu0 %v383_v17 }
  0x65   : > { %3028 = vmatprep.mubr.f32.mxu0 %v3653_v29 }
  0x68   : > { %3029 = vmatmul.mubr.f32.vlgmr.msra.gmra.mrb[0].mxu0 %v3655_v30 }
  0x69   : > { %3175 = vmatpush3.bf16.msra.mxu0 %v3609_v6  ;;  %3031 = vmatprep.mubr.f32.mxu0 %v3657_v31  ;;  %v1088_v6 = vld [vmem:[%s4200_s2 + $0x20] sm:$0xf] }
  0x6a   : > { %v1118_v8 = vsel %vm240_vm0, %v1088_v6, 0 }
  0x6b   : > { %v1127_v32 = vand.u32 4294901760, %v1118_v8 }
  0x6c   : > { %3032 = vmatmul.mubr.f32.gmra.mrb[2].mxu0 %v3664_v36 }
  0x6d   : > { %3034 = vmatprep.mubr.f32.mxu0 %v3677_v42  ;;  %v3798_v43 = vsub.f32 %v1118_v8, %v1127_v32 }
  0x6f   : > { %v1294_v49 = vand.u32 4294901760, %v3798_v43  ;;  %v3184_v16 = vpack.c.bf16 %v3798_v43, %v3791_v38 }
  0x70   : > { %3035 = vmatmul.mubr.f32.gmra.mrb[4].mxu0 %v3682_v44 }
  0x71   : > { %3037 = vmatprep.mubr.f32.mxu0 %v3714_v61  ;;  %v1295_v51 = vsub.f32 %v3798_v43, %v1294_v49 }
  0x73   : > { %v1296_v53 = vand.u32 4294901760, %v1295_v51 }
  0x74   : > { %3038 = vmatmul.mubr.f32.gmra.mrb[6].mxu0 %v3716_v62 }
  0x75   : > { %3044 = vmatprep.mubr.f32.mxu0 %v3653_v29  ;;  %v1125_v29 = vand.u32 4294901760, %v1084_v7  ;;  %v3180_v54 = vpack.c.bf16 %v1296_v53, %v1284_v52 }
  0x77   : > { %v3793_v40 = vsub.f32 %v1084_v7, %v1125_v29  ;;  %v3800_v45 = vpack.c.bf16 %v1129_v39, %v1125_v29 }
  0x78   : > { %3045 = vmatmul.mubr.f32.vlgmr.msra.gmra.mrb[0].mxu0 %v3655_v30  ;;  %v1086_v30 = vld [vmem:[%s4200_s2 + $0x10] sm:$0xff] }
  0x79   : > { %3047 = vmatprep.mubr.f32.mxu0 %v3657_v31  ;;  %v3523_v31 = vmov 0.0   ;;  %v1958_v37 = vand.u32 4294901760, %v1086_v30  ;;  %v1288_v55 = vand.u32 4294901760, %v3793_v40  ;;  %v3186_v17 = vpack.c.bf16 %v3802_v46, %v3793_v40 }
  0x7a   : > { %1191 = vmatprep.mubr.f32.mxu1 %v3523_v31 }
  0x7b   : > { %v1289_v57 = vsub.f32 %v3793_v40, %v1288_v55  ;;  %v3194_v38 = vpack.c.bf16 %v1300_v56, %v1288_v55 }
  0x7c   : > { %3048 = vmatmul.mubr.f32.gmra.mrb[2].mxu0 %v3664_v36  ;;  %v1089_v36 = vld [vmem:[%s4200_s2 + $0x28] sm:$0xf] }
  0x7d   : > { %3050 = vmatprep.mubr.f32.mxu0 %v3677_v42  ;;  %v1121_v41 = vsel %vm240_vm0, %v1089_v36, 0  ;;  %v3796_v42 = vpack.c.bf16 %v1127_v32, %v1123_v9  ;;  %v1290_v59 = vand.u32 4294901760, %v1289_v57 }
  0x7f   : > { %3177 = vmatprep.subr.bf16.mxu1 %v3796_v42  ;;  %v3826_v63 = vpack.c.bf16 %v1302_v60, %v1290_v59 }
  0x80   : > { %3051 = vmatmul.mubr.f32.gmra.mrb[4].mxu0 %v3682_v44  ;;  %v1961_v44 = vand.u32 4294901760, %v1121_v41  ;;  %3179 = vmatpush1.bf16.msra.mxu1 %v3800_v45 }
  0x81   : > { %3053 = vmatprep.mubr.f32.mxu0 %v3714_v61  ;;  %3181 = vmatprep.subr.bf16.mxu1 %v3180_v54  ;;  %v2106_v61 = vsub.f32 %v1086_v30, %v1958_v37 }
  0x82   : > { %v3806_v48 = vpack.c.bf16 %v1961_v44, %v1958_v37 }
  0x83   : > { %v2107_v0 = vand.u32 4294901760, %v2106_v61 }
  0x84   : > { %3054 = vmatmul.mubr.f32.gmra.mrb[6].mxu0 %v3716_v62  ;;  %3201 = vmatprep.subr.bf16.mxu0 %v3806_v48  ;;  %v2113_v62 = vsub.f32 %v1121_v41, %v1961_v44 }
  0x85   : > { %3203 = vmatpush3.bf16.msra.mxu0 %v3806_v48  ;;  %v2108_v2 = vsub.f32 %v2106_v61, %v2107_v0 }
  0x86   : > { %v2114_v1 = vand.u32 4294901760, %v2113_v62  ;;  %v3831_v15 = vpack.c.bf16 %v2113_v62, %v2106_v61 }
  0x87   : > { %v2109_v4 = vand.u32 4294901760, %v2108_v2 }
  0x88   : > { %v2115_v3 = vsub.f32 %v2113_v62, %v2114_v1  ;;  %v3837_v21 = vpack.c.bf16 %v2114_v1, %v2107_v0 }
  0x8a   : > { %v2116_v11 = vand.u32 4294901760, %v2115_v3 }
  0x8c   : > { %v3828_v14 = vpack.c.bf16 %v2116_v11, %v2109_v4 }
  0x8e   : > { %3205 = vmatprep.subr.bf16.mxu0 %v3828_v14 }
 0x14b   : > { %v3046_v22 = vpop.f32.mrb[0].mxu0 }
 0x14c   : > { %3427 = vrsqrt.f32 %v3046_v22  ;;  %v958_v23 = vpop.f32.mrb[1].mxu0  ;;  %vm1013_vm2 = vcmp.eq.f32.partialorder %v3046_v22, inf  ;;  %vm1015_vm3 = vcmp.eq.f32.partialorder %v3046_v22, 0.0  ;;  %v1016_v9 = vand.u32 2147483648, %v3046_v22 }
 0x14d   : > { %3429 = vrsqrt.f32 %v958_v23  ;;  %vm1006_vm4 = vcmp.eq.f32.partialorder %v958_v23, inf  ;;  %v1009_v32 = vand.u32 2147483648, %v958_v23  ;;  %vm1008_vm5 = vcmp.eq.f32.partialorder %v958_v23, 0.0 }
 0x14f   : > { %v3049_v24 = vpop.f32.mrb[2].mxu0 }
 0x150   : > { %3431 = vrsqrt.f32 %v3049_v24  ;;  %v970_v25 = vpop.f32.mrb[3].mxu0  ;;  %vm1027_vm6 = vcmp.eq.f32.partialorder %v3049_v24, inf  ;;  %vm1029_vm7 = vcmp.eq.f32.partialorder %v3049_v24, 0.0  ;;  %v1030_v52 = vand.u32 2147483648, %v3049_v24 }
 0x151   : > { %3433 = vrsqrt.f32 %v970_v25  ;;  %vm1020_vm8 = vcmp.eq.f32.partialorder %v970_v25, inf  ;;  %v1023_v57 = vand.u32 2147483648, %v970_v25  ;;  %vm1022_vm9 = vcmp.eq.f32.partialorder %v970_v25, 0.0 }
 0x153   : > { %v3052_v26 = vpop.f32.mrb[4].mxu0 }
 0x154   : > { %3435 = vrsqrt.f32 %v3052_v26  ;;  %v982_v27 = vpop.f32.mrb[5].mxu0  ;;  %vm1041_vm10 = vcmp.eq.f32.partialorder %v3052_v26, inf  ;;  %vm1043_vm11 = vcmp.eq.f32.partialorder %v3052_v26, 0.0  ;;  %v1044_v3 = vand.u32 2147483648, %v3052_v26 }
 0x155   : > { %3437 = vrsqrt.f32 %v982_v27  ;;  %vm1034_vm12 = vcmp.eq.f32.partialorder %v982_v27, inf  ;;  %vm1036_vm13 = vcmp.eq.f32.partialorder %v982_v27, 0.0 }
 0x156   : > { %v3428_v5 = vpop.eup %3427 }
 0x157   : > { %v3430_v6 = vpop.eup %3429  ;;  %v1012_v7 = vmul.f32 %v3428_v5, %v3046_v22  ;;  %v3839_v8 = vpop.f32.mrb[6].mxu0 }
 0x158   : > { %v1005_v28 = vmul.f32 %v3430_v6, %v958_v23  ;;  %3439 = vrsqrt.f32 %v3839_v8  ;;  %v3842_v29 = vpop.f32.mrb[7].mxu0  ;;  %vm1055_vm14 = vcmp.eq.f32.partialorder %v3839_v8, inf  ;;  %vm1057_vm15 = vcmp.eq.f32.partialorder %v3839_v8, 0.0 }
 0x159   : > { %v1014_v30 = vsel %vm1013_vm2, %v3046_v22, %v1012_v7  ;;  %3441 = vrsqrt.f32 %v3842_v29  ;;  %v1037_v22 = vand.u32 2147483648, %v982_v27  ;;  %vm1048_vm0 = vcmp.eq.f32.partialorder %v3842_v29, inf }
 0x15a   : > { %v3432_v35 = vpop.eup %3431  ;;  %v1017_v36 = vsel %vm1015_vm3, %v1016_v9, %v1014_v30  ;;  %v1007_v37 = vsel %vm1006_vm4, %v958_v23, %v1005_v28  ;;  %v1058_v30 = vand.u32 2147483648, %v3839_v8  ;;  %vm1050_vm2 = vcmp.eq.f32.partialorder %v3842_v29, 0.0 }
 0x15b   : > { %v3434_v39 = vpop.eup %3433  ;;  %v1061_v41 = vadd.f32 1e-07, %v1017_v36  ;;  %v1010_v44 = vsel %vm1008_vm5, %v1009_v32, %v1007_v37  ;;  %v1026_v50 = vmul.f32 %v3432_v35, %v3049_v24 }
 0x15c   : > { %v1060_v51 = vadd.f32 1e-07, %v1010_v44  ;;  %v1019_v53 = vmul.f32 %v3434_v39, %v970_v25 }
 0x15d   : > { %3443 = vrcp.f32 %v1061_v41  ;;  %v1028_v54 = vsel %vm1027_vm6, %v3049_v24, %v1026_v50 }
 0x15e   : > { %v3436_v58 = vpop.eup %3435  ;;  %3445 = vrcp.f32 %v1060_v51  ;;  %v1031_v59 = vsel %vm1029_vm7, %v1030_v52, %v1028_v54  ;;  %v1021_v60 = vsel %vm1020_vm8, %v970_v25, %v1019_v53 }
 0x15f   : > { %v3438_v61 = vpop.eup %3437  ;;  %v1063_v62 = vadd.f32 1e-07, %v1031_v59  ;;  %v1024_v0 = vsel %vm1022_vm9, %v1023_v57, %v1021_v60  ;;  %v1040_v1 = vmul.f32 %v3436_v58, %v3052_v26 }
 0x160   : > { %v1062_v2 = vadd.f32 1e-07, %v1024_v0  ;;  %v1033_v4 = vmul.f32 %v3438_v61, %v982_v27 }
 0x161   : > { %3447 = vrcp.f32 %v1063_v62  ;;  %v1042_v11 = vsel %vm1041_vm10, %v3052_v26, %v1040_v1 }
 0x162   : > { %v3440_v23 = vpop.eup %3439  ;;  %3449 = vrcp.f32 %v1062_v2  ;;  %v1045_v24 = vsel %vm1043_vm11, %v1044_v3, %v1042_v11  ;;  %v1035_v5 = vsel %vm1034_vm12, %v982_v27, %v1033_v4  ;;  %v1051_v27 = vand.u32 2147483648, %v3842_v29 }
 0x163   : > { %v3442_v6 = vpop.eup %3441  ;;  %v1065_v25 = vadd.f32 1e-07, %v1045_v24  ;;  %v1038_v7 = vsel %vm1036_vm13, %v1037_v22, %v1035_v5  ;;  %v1054_v9 = vmul.f32 %v3440_v23, %v3839_v8 }
 0x164   : > { %v1064_v28 = vadd.f32 1e-07, %v1038_v7  ;;  %v1047_v26 = vmul.f32 %v3442_v6, %v3842_v29 }
 0x165   : > { %3451 = vrcp.f32 %v1065_v25  ;;  %v1056_v32 = vsel %vm1055_vm14, %v3839_v8, %v1054_v9 }
 0x166   : > { %3453 = vrcp.f32 %v1064_v28  ;;  %v1059_v35 = vsel %vm1057_vm15, %v1058_v30, %v1056_v32  ;;  %v1049_v36 = vsel %vm1048_vm0, %v3842_v29, %v1047_v26 }
 0x167   : > { %v3444_v37 = vpop.eup %3443  ;;  %v1067_v39 = vadd.f32 1e-07, %v1059_v35  ;;  %v1052_v41 = vsel %vm1050_vm2, %v1051_v27, %v1049_v36 }
 0x168   : > { %v3446_v44 = vpop.eup %3445  ;;  %v1066_v50 = vadd.f32 1e-07, %v1052_v41  ;;  %v1077_v51 = vmul.f32 %v3444_v37, %v3625_v12 }
 0x169   : > { %3455 = vrcp.f32 %v1067_v39  ;;  %v1076_v8 = vmul.f32 %v3446_v44, %v3620_v10 }
 0x16a   : > { %3457 = vrcp.f32 %v1066_v50  ;;  %v1094_v52 = vsel %vm215_vm1, %v1077_v51, 0 }
 0x16b   : > { %v3448_v53 = vpop.eup %3447  ;;  %v1091_v54 = vsel %vm215_vm1, %v1076_v8, 0  ;;  %v3859_v57 = vand.u32 4294901760, %v1094_v52 }
 0x16c   : > { %v3450_v58 = vpop.eup %3449  ;;  %v3861_v29 = vand.u32 4294901760, %v1091_v54  ;;  %v1079_v59 = vmul.f32 %v3448_v53, %v3638_v18 }
 0x16d   : > { %v3865_v60 = vsub.f32 %v1094_v52, %v3859_v57  ;;  %v1078_v12 = vmul.f32 %v3450_v58, %v3627_v13 }
 0x16e   : > { %v3869_v10 = vsub.f32 %v1091_v54, %v3861_v29  ;;  %v1100_v61 = vsel %vm215_vm1, %v1079_v59, 0 }
 0x16f   : > { %v3452_v62 = vpop.eup %3451  ;;  %v3873_v0 = vand.u32 4294901760, %v3865_v60  ;;  %v1097_v1 = vsel %vm215_vm1, %v1078_v12, 0  ;;  %v3876_v2 = vand.u32 4294901760, %v1100_v61 }
 0x170   : > { %v3454_v3 = vpop.eup %3453  ;;  %v3879_v18 = vand.u32 4294901760, %v3869_v10  ;;  %v3881_v4 = vand.u32 4294901760, %v1097_v1  ;;  %v1081_v13 = vmul.f32 %v3452_v62, %v3642_v20 }
 0x171   : > { %v1206_v11 = vsub.f32 %v3865_v60, %v3873_v0  ;;  %v3887_v22 = vsub.f32 %v1100_v61, %v3876_v2  ;;  %v1080_v23 = vmul.f32 %v3454_v3, %v3640_v19 }
 0x172   : > { %v1195_v24 = vsub.f32 %v3869_v10, %v3879_v18  ;;  %v3893_v5 = vsub.f32 %v1097_v1, %v3881_v4  ;;  %v1106_v6 = vsel %vm215_vm1, %v1081_v13, 0 }
 0x173   : > { %v3456_v25 = vpop.eup %3455  ;;  %v3897_v7 = vand.u32 4294901760, %v3887_v22  ;;  %v1103_v20 = vsel %vm215_vm1, %v1080_v23, 0  ;;  %v3900_v9 = vand.u32 4294901760, %v1106_v6  ;;  %v1207_v27 = vand.u32 4294901760, %v1206_v11 }
 0x174   : > { %v3458_v28 = vpop.eup %3457  ;;  %v1196_v30 = vand.u32 4294901760, %v1195_v24  ;;  %v3903_v19 = vand.u32 4294901760, %v3893_v5  ;;  %v3905_v26 = vand.u32 4294901760, %v1103_v20  ;;  %v1083_v32 = vmul.f32 %v3456_v25, %v3662_v34 }
 0x175   : > { %v1228_v35 = vsub.f32 %v3887_v22, %v3897_v7  ;;  %v3911_v36 = vsub.f32 %v1106_v6, %v3900_v9  ;;  %v1082_v37 = vmul.f32 %v3458_v28, %v3660_v33 }
 0x176   : > { %1197 = vmatmul.mubr.f32.vlgmr.msra.gmra.mrb[0].mxu1 %v1196_v30  ;;  %3060 = vmatprep.mubr.f32.mxu0 %v1196_v30  ;;  %v1217_v39 = vsub.f32 %v3893_v5, %v3903_v19  ;;  %v3917_v41 = vsub.f32 %v1103_v20, %v3905_v26  ;;  %v1112_v44 = vsel %vm215_vm1, %v1083_v32, 0 }
 0x177   : > { %3183 = vmatpush1.bf16.msra.mxu1 %v3826_v63  ;;  %3061 = vmatmul.mubr.f32.vlgmr.msra.gmra.mrb[8].mxu0 %v1207_v27  ;;  %v3922_v34 = vand.u32 4294901760, %v3911_v36  ;;  %v1109_v50 = vsel %vm215_vm1, %v1082_v37, 0  ;;  %v3925_v51 = vand.u32 4294901760, %v1112_v44  ;;  %v1229_v53 = vand.u32 4294901760, %v1228_v35 }
 0x178   : > { %1202 = vmatprep.mubr.f32.mxu1 %v3523_v31  ;;  %v1218_v33 = vand.u32 4294901760, %v1217_v39  ;;  %v3929_v8 = vand.u32 4294901760, %v3917_v41  ;;  %v3931_v52 = vand.u32 4294901760, %v1109_v50  ;;  %3207 = vmatpush3.bf16.msra.mxu0 %v3828_v14 }
 0x179   : > { %v1250_v63 = vsub.f32 %v3911_v36, %v3922_v34  ;;  %v3937_v54 = vsub.f32 %v1112_v44, %v3925_v51  ;;  %3209 = vmatprep.subr.bf16.mxu0 %v3831_v15  ;;  %3185 = vmatprep.subr.bf16.mxu1 %v3184_v16 }
 0x17a   : > { %1208 = vmatmul.mubr.f32.gmra.mrb[2].mxu1 %v1207_v27  ;;  %3063 = vmatprep.mubr.f32.mxu0 %v1218_v33  ;;  %v1239_v58 = vsub.f32 %v3917_v41, %v3929_v8  ;;  %v3946_v14 = vsub.f32 %v1109_v50, %v3931_v52 }
 0x17b   : > { %3064 = vmatmul.mubr.f32.gmra.mrb[10].mxu0 %v1229_v53  ;;  %1213 = vmatprep.mubr.f32.mxu1 %v3523_v31  ;;  %v3950_v59 = vand.u32 4294901760, %v3937_v54  ;;  %v1251_v62 = vand.u32 4294901760, %v1250_v63 }
 0x17c   : > { %v1240_v12 = vand.u32 4294901760, %v1239_v58  ;;  %v3953_v61 = vand.u32 4294901760, %v3946_v14 }
 0x17d   : > { %v1272_v16 = vsub.f32 %v3937_v54, %v3950_v59 }
 0x17e   : > { %1219 = vmatmul.mubr.f32.gmra.mrb[4].mxu1 %v1218_v33  ;;  %3066 = vmatprep.mubr.f32.mxu0 %v1240_v12  ;;  %v1261_v1 = vsub.f32 %v3946_v14, %v3953_v61 }
 0x17f   : > { %3067 = vmatmul.mubr.f32.gmra.mrb[12].mxu0 %v1251_v62  ;;  %1224 = vmatprep.mubr.f32.mxu1 %v3523_v31  ;;  %v1273_v13 = vand.u32 4294901760, %v1272_v16 }
 0x180   : > { %v1262_v3 = vand.u32 4294901760, %v1261_v1 }
 0x182   : > { %1230 = vmatmul.mubr.f32.gmra.mrb[6].mxu1 %v1229_v53  ;;  %3069 = vmatprep.mubr.f32.mxu0 %v1262_v3 }
 0x183   : > { %3070 = vmatmul.mubr.f32.gmra.mrb[14].mxu0 %v1273_v13  ;;  %1235 = vmatprep.mubr.f32.mxu1 %v3523_v31 }
 0x184   : > { %3076 = vmatprep.mubr.f32.mxu0 %v3861_v29 }
 0x186   : > { %1241 = vmatmul.mubr.f32.gmra.mrb[8].mxu1 %v1240_v12 }
 0x187   : > { %3077 = vmatmul.mubr.f32.vlgmr.msra.gmra.mrb[8].mxu0 %v3859_v57  ;;  %1246 = vmatprep.mubr.f32.mxu1 %v3523_v31 }
 0x188   : > { %3079 = vmatprep.mubr.f32.mxu0 %v3881_v4  ;;  %3211 = vmatpush3.bf16.msra.mxu0 %v3831_v15  ;;  %v3192_v15 = vpack.c.bf16 %v1294_v49, %v1282_v47 }
 0x189   : > { %3213 = vmatprep.subr.bf16.mxu0 %v3806_v48 }
 0x18a   : > { %1252 = vmatmul.mubr.f32.gmra.mrb[10].mxu1 %v1251_v62 }
 0x18b   : > { %3080 = vmatmul.mubr.f32.gmra.mrb[10].mxu0 %v3876_v2  ;;  %1257 = vmatprep.mubr.f32.mxu1 %v3523_v31 }
 0x18c   : > { %3082 = vmatprep.mubr.f32.mxu0 %v3905_v26 }
 0x18e   : > { %1263 = vmatmul.mubr.f32.gmra.mrb[12].mxu1 %v1262_v3 }
 0x18f   : > { %3083 = vmatmul.mubr.f32.gmra.mrb[12].mxu0 %v3900_v9  ;;  %1268 = vmatprep.mubr.f32.mxu1 %v3523_v31 }
 0x190   : > { %3085 = vmatprep.mubr.f32.mxu0 %v3931_v52 }
 0x192   : > { %1274 = vmatmul.mubr.f32.gmra.mrb[14].mxu1 %v1273_v13 }
 0x193   : > { %3086 = vmatmul.mubr.f32.gmra.mrb[14].mxu0 %v3925_v51  ;;  %1364 = vmatprep.mubr.f32.mxu1 %v3523_v31 }
 0x194   : > { %3092 = vmatprep.mubr.f32.mxu0 %v3869_v10 }
 0x196   : > { %1366 = vmatmul.mubr.f32.vlgmr.msra.gmra.mrb[0].mxu1 %v3861_v29 }
 0x197   : > { %3187 = vmatpush1.bf16.msra.mxu1 %v3186_v17  ;;  %3093 = vmatmul.mubr.f32.vlgmr.msra.gmra.mrb[8].mxu0 %v3865_v60 }
 0x198   : > { %3095 = vmatprep.mubr.f32.mxu0 %v3893_v5  ;;  %1371 = vmatprep.mubr.f32.mxu1 %v3523_v31 }
 0x199   : > { %3215 = vmatpush3.bf16.msra.mxu0 %v3806_v48  ;;  %3189 = vmatprep.subr.bf16.mxu1 %v3796_v42 }
 0x19a   : > { %1373 = vmatmul.mubr.f32.gmra.mrb[2].mxu1 %v3859_v57  ;;  %3217 = vmatprep.subr.bf16.mxu0 %v3837_v21 }
 0x19b   : > { %3096 = vmatmul.mubr.f32.gmra.mrb[10].mxu0 %v3887_v22  ;;  %1378 = vmatprep.mubr.f32.mxu1 %v3523_v31 }
 0x19c   : > { %3098 = vmatprep.mubr.f32.mxu0 %v3917_v41 }
 0x19e   : > { %1380 = vmatmul.mubr.f32.gmra.mrb[4].mxu1 %v3881_v4 }
 0x19f   : > { %3099 = vmatmul.mubr.f32.gmra.mrb[12].mxu0 %v3911_v36  ;;  %1385 = vmatprep.mubr.f32.mxu1 %v3523_v31 }
 0x1a0   : > { %3101 = vmatprep.mubr.f32.mxu0 %v3946_v14 }
 0x1a2   : > { %1387 = vmatmul.mubr.f32.gmra.mrb[6].mxu1 %v3876_v2 }
 0x1a3   : > { %3102 = vmatmul.mubr.f32.gmra.mrb[14].mxu0 %v3937_v54  ;;  %1392 = vmatprep.mubr.f32.mxu1 %v3523_v31 }
 0x1a4   : > { %3108 = vmatprep.mubr.f32.mxu0 %v3879_v18 }
 0x1a6   : > { %1394 = vmatmul.mubr.f32.gmra.mrb[8].mxu1 %v3905_v26 }
 0x1a7   : > { %3109 = vmatmul.mubr.f32.vlgmr.msra.gmra.mrb[8].mxu0 %v3873_v0  ;;  %1399 = vmatprep.mubr.f32.mxu1 %v3523_v31 }
 0x1a8   : > { %3111 = vmatprep.mubr.f32.mxu0 %v3903_v19  ;;  %3219 = vmatpush3.bf16.msra.mxu0 %v3837_v21 }
 0x1a9   : > { %3221 = vmatprep.subr.bf16.mxu0 %v3806_v48 }
 0x1aa   : > { %1401 = vmatmul.mubr.f32.gmra.mrb[10].mxu1 %v3900_v9 }
 0x1ab   : > { %3112 = vmatmul.mubr.f32.gmra.mrb[10].mxu0 %v3897_v7  ;;  %1406 = vmatprep.mubr.f32.mxu1 %v3523_v31 }
 0x1ac   : > { %3114 = vmatprep.mubr.f32.mxu0 %v3929_v8 }
 0x1ae   : > { %1408 = vmatmul.mubr.f32.gmra.mrb[12].mxu1 %v3931_v52 }
 0x1af   : > { %3115 = vmatmul.mubr.f32.gmra.mrb[12].mxu0 %v3922_v34  ;;  %1413 = vmatprep.mubr.f32.mxu1 %v3523_v31 }
 0x1b0   : > { %3117 = vmatprep.mubr.f32.mxu0 %v3953_v61 }
 0x1b2   : > { %1415 = vmatmul.mubr.f32.gmra.mrb[14].mxu1 %v3925_v51 }
 0x1b3   : > { %3118 = vmatmul.mubr.f32.gmra.mrb[14].mxu0 %v3950_v59  ;;  %1493 = vmatprep.mubr.f32.mxu1 %v3523_v31 }
 0x1b4   : > { %3124 = vmatprep.mubr.f32.mxu0 %v3861_v29 }
 0x1b6   : > { %1496 = vmatmul.mubr.f32.vlgmr.msra.gmra.mrb[0].mxu1 %v3869_v10 }
 0x1b7   : > { %3191 = vmatpush1.bf16.msra.mxu1 %v3800_v45  ;;  %3125 = vmatmul.mubr.f32.vlgmr.msra.gmra.mrb[8].mxu0 %v3859_v57 }
 0x1b8   : > { %3127 = vmatprep.mubr.f32.mxu0 %v3881_v4  ;;  %1501 = vmatprep.mubr.f32.mxu1 %v3523_v31 }
 0x1b9   : > { %3223 = vmatpush3.bf16.msra.mxu0 %v3806_v48  ;;  %3193 = vmatprep.subr.bf16.mxu1 %v3192_v15 }
 0x1ba   : > { %1504 = vmatmul.mubr.f32.gmra.mrb[2].mxu1 %v3865_v60 }
 0x1bb   : > { %3128 = vmatmul.mubr.f32.gmra.mrb[10].mxu0 %v3876_v2  ;;  %1509 = vmatprep.mubr.f32.mxu1 %v3523_v31 }
 0x1bc   : > { %3130 = vmatprep.mubr.f32.mxu0 %v3905_v26 }
 0x1be   : > { %1512 = vmatmul.mubr.f32.gmra.mrb[4].mxu1 %v3893_v5 }
 0x1bf   : > { %3131 = vmatmul.mubr.f32.gmra.mrb[12].mxu0 %v3900_v9  ;;  %1517 = vmatprep.mubr.f32.mxu1 %v3523_v31 }
 0x1c0   : > { %3133 = vmatprep.mubr.f32.mxu0 %v3931_v52 }
 0x1c2   : > { %1520 = vmatmul.mubr.f32.gmra.mrb[6].mxu1 %v3887_v22 }
 0x1c3   : > { %3134 = vmatmul.mubr.f32.gmra.mrb[14].mxu0 %v3925_v51  ;;  %1525 = vmatprep.mubr.f32.mxu1 %v3523_v31 }
 0x1c4   : > { %3140 = vmatprep.mubr.f32.mxu0 %v3861_v29 }
 0x1c6   : > { %1528 = vmatmul.mubr.f32.gmra.mrb[8].mxu1 %v3917_v41 }
 0x1c7   : > { %3141 = vmatmul.mubr.f32.vlgmr.msra.gmra.mrb[8].mxu0 %v3859_v57  ;;  %1533 = vmatprep.mubr.f32.mxu1 %v3523_v31 }
 0x1c8   : > { %3143 = vmatprep.mubr.f32.mxu0 %v3881_v4 }
 0x1ca   : > { %1536 = vmatmul.mubr.f32.gmra.mrb[10].mxu1 %v3911_v36 }
 0x1cb   : > { %3144 = vmatmul.mubr.f32.gmra.mrb[10].mxu0 %v3876_v2  ;;  %1541 = vmatprep.mubr.f32.mxu1 %v3523_v31 }
 0x1cc   : > { %3146 = vmatprep.mubr.f32.mxu0 %v3905_v26 }
 0x1ce   : > { %1544 = vmatmul.mubr.f32.gmra.mrb[12].mxu1 %v3946_v14 }
 0x1cf   : > { %3147 = vmatmul.mubr.f32.gmra.mrb[12].mxu0 %v3900_v9  ;;  %1549 = vmatprep.mubr.f32.mxu1 %v3523_v31 }
 0x1d0   : > { %3149 = vmatprep.mubr.f32.mxu0 %v3931_v52 }
 0x1d2   : > { %1552 = vmatmul.mubr.f32.gmra.mrb[14].mxu1 %v3937_v54 }
 0x1d3   : > { %3150 = vmatmul.mubr.f32.gmra.mrb[14].mxu0 %v3925_v51  ;;  %1626 = vmatprep.mubr.f32.mxu1 %v3523_v31 }
 0x1d6   : > { %1630 = vmatmul.mubr.f32.vlgmr.msra.gmra.mrb[0].mxu1 %v3879_v18 }
 0x1d7   : > { %3195 = vmatpush1.bf16.msra.mxu1 %v3194_v38  ;;  %1635 = vmatprep.mubr.f32.mxu1 %v3523_v31 }
 0x1d8   : > { %3197 = vmatprep.subr.bf16.mxu1 %v3796_v42 }
 0x1da   : > { %1639 = vmatmul.mubr.f32.gmra.mrb[2].mxu1 %v3873_v0 }
 0x1db   : > { %1644 = vmatprep.mubr.f32.mxu1 %v3523_v31 }
 0x1de   : > { %1648 = vmatmul.mubr.f32.gmra.mrb[4].mxu1 %v3903_v19 }
 0x1df   : > { %1653 = vmatprep.mubr.f32.mxu1 %v3523_v31 }
 0x1e2   : > { %1657 = vmatmul.mubr.f32.gmra.mrb[6].mxu1 %v3897_v7 }
 0x1e3   : > { %1662 = vmatprep.mubr.f32.mxu1 %v3523_v31 }
 0x1e6   : > { %1666 = vmatmul.mubr.f32.gmra.mrb[8].mxu1 %v3929_v8 }
 0x1e7   : > { %1671 = vmatprep.mubr.f32.mxu1 %v3523_v31 }
 0x1ea   : > { %1675 = vmatmul.mubr.f32.gmra.mrb[10].mxu1 %v3922_v34 }
 0x1eb   : > { %1680 = vmatprep.mubr.f32.mxu1 %v3523_v31 }
 0x1ee   : > { %1684 = vmatmul.mubr.f32.gmra.mrb[12].mxu1 %v3953_v61 }
 0x1ef   : > { %1689 = vmatprep.mubr.f32.mxu1 %v3523_v31 }
 0x1f2   : > { %1693 = vmatmul.mubr.f32.gmra.mrb[14].mxu1 %v3950_v59 }
 0x1f3   : > { %1775 = vmatprep.mubr.f32.mxu1 %v3523_v31 }
 0x1f6   : > { %1777 = vmatmul.mubr.f32.vlgmr.msra.gmra.mrb[0].mxu1 %v3861_v29 }
 0x1f7   : > { %3199 = vmatpush1.bf16.msra.mxu1 %v3800_v45  ;;  %1782 = vmatprep.mubr.f32.mxu1 %v3523_v31 }
 0x1fa   : > { %1784 = vmatmul.mubr.f32.gmra.mrb[2].mxu1 %v3859_v57 }
 0x1fb   : > { %1789 = vmatprep.mubr.f32.mxu1 %v3523_v31 }
 0x1fe   : > { %1791 = vmatmul.mubr.f32.gmra.mrb[4].mxu1 %v3881_v4 }
 0x1ff   : > { %1796 = vmatprep.mubr.f32.mxu1 %v3523_v31 }
 0x202   : > { %1798 = vmatmul.mubr.f32.gmra.mrb[6].mxu1 %v3876_v2 }
 0x203   : > { %1803 = vmatprep.mubr.f32.mxu1 %v3523_v31 }
 0x206   : > { %1805 = vmatmul.mubr.f32.gmra.mrb[8].mxu1 %v3905_v26 }
 0x207   : > { %1810 = vmatprep.mubr.f32.mxu1 %v3523_v31 }
 0x20a   : > { %1812 = vmatmul.mubr.f32.gmra.mrb[10].mxu1 %v3900_v9 }
 0x20b   : > { %1817 = vmatprep.mubr.f32.mxu1 %v3523_v31 }
 0x20e   : > { %1819 = vmatmul.mubr.f32.gmra.mrb[12].mxu1 %v3931_v52 }
 0x20f   : > { %1824 = vmatprep.mubr.f32.mxu1 %v3523_v31 }
 0x212   : > { %1826 = vmatmul.mubr.f32.gmra.mrb[14].mxu1 %v3925_v51 }
 0x213   : > { %1900 = vmatprep.mubr.f32.mxu1 %v3523_v31 }
 0x216   : > { %1902 = vmatmul.mubr.f32.vlgmr.msra.gmra.mrb[0].mxu1 %v3861_v29 }
 0x217   : > { %1907 = vmatprep.mubr.f32.mxu1 %v3523_v31 }
 0x21a   : > { %1909 = vmatmul.mubr.f32.gmra.mrb[2].mxu1 %v3859_v57 }
 0x21b   : > { %1914 = vmatprep.mubr.f32.mxu1 %v3523_v31 }
 0x21e   : > { %1916 = vmatmul.mubr.f32.gmra.mrb[4].mxu1 %v3881_v4 }
 0x21f   : > { %1921 = vmatprep.mubr.f32.mxu1 %v3523_v31 }
 0x222   : > { %1923 = vmatmul.mubr.f32.gmra.mrb[6].mxu1 %v3876_v2 }
 0x223   : > { %1928 = vmatprep.mubr.f32.mxu1 %v3523_v31 }
 0x226   : > { %1930 = vmatmul.mubr.f32.gmra.mrb[8].mxu1 %v3905_v26 }
 0x227   : > { %1935 = vmatprep.mubr.f32.mxu1 %v3523_v31 }
 0x22a   : > { %1937 = vmatmul.mubr.f32.gmra.mrb[10].mxu1 %v3900_v9 }
 0x22b   : > { %1942 = vmatprep.mubr.f32.mxu1 %v3523_v31 }
 0x22e   : > { %1944 = vmatmul.mubr.f32.gmra.mrb[12].mxu1 %v3931_v52 }
 0x22f   : > { %1949 = vmatprep.mubr.f32.mxu1 %v3523_v31 }
 0x232   : > { %1951 = vmatmul.mubr.f32.gmra.mrb[14].mxu1 %v3925_v51 }
 0x29a   : > { %v3142_v40 = vpop.f32.mrb[8].mxu0 }
 0x29b   : > { %2722 = vst [vmem:[%s4109_s4 + $0x28] sm:$0xff] %v3142_v40  ;;  %v2671_v42 = vpop.f32.mrb[9].mxu0 }
 0x29c   : > { %2719 = vst [vmem:[%s4109_s4 + $0x10] sm:$0xff] %v2671_v42 }
 0x29e   : > { %v3145_v31 = vpop.f32.mrb[10].mxu0 }
 0x29f   : > { %2728 = vst [vmem:[%s4109_s4 + $0x58] sm:$0xff] %v3145_v31  ;;  %v2683_v43 = vpop.f32.mrb[11].mxu0 }
 0x2a0   : > { %2725 = vst [vmem:[%s4109_s4 + $0x40] sm:$0xff] %v2683_v43 }
 0x2a2   : > { %v3148_v45 = vpop.f32.mrb[12].mxu0 }
 0x2a3   : > { %2734 = vst [vmem:[%s4109_s4 + $0x88] sm:$0xff] %v3148_v45  ;;  %v2695_v46 = vpop.f32.mrb[13].mxu0 }
 0x2a4   : > { %2731 = vst [vmem:[%s4109_s4 + $0x70] sm:$0xff] %v2695_v46 }
 0x2a6   : > { %v3151_v47 = vpop.f32.mrb[14].mxu0 }
 0x2a7   : > { %2740 = vst [vmem:[%s4109_s4 + $0xb8] sm:$0xff] %v3151_v47  ;;  %v2707_v48 = vpop.f32.mrb[15].mxu0 }
 0x2a8   : > { %2737 = vst [vmem:[%s4109_s4 + $0xa0] sm:$0xff] %v2707_v48 }
 0x2e9   : > { %v1903_v49 = vpop.f32.mrb[0].mxu1 }
 0x2ea   : > { %2717 = vst [vmem:[%s4109_s4] sm:$0xff] %v1903_v49  ;;  %v1905_v55 = vpop.f32.mrb[1].mxu1 }
 0x2eb   : > { %2718 = vst [vmem:[%s4109_s4 + $0x8] sm:$0xff] %v1905_v55 }
 0x2ed   : > { %v1910_v56 = vpop.f32.mrb[2].mxu1 }
 0x2ee   : > { %2720 = vst [vmem:[%s4109_s4 + $0x18] sm:$0xff] %v1910_v56  ;;  %v1912_v17 = vpop.f32.mrb[3].mxu1 }
 0x2ef   : > { %2721 = vst [vmem:[%s4109_s4 + $0x20] sm:$0xff] %v1912_v17 }
 0x2f1   : > { %v1917_v21 = vpop.f32.mrb[4].mxu1 }
 0x2f2   : > { %2723 = vst [vmem:[%s4109_s4 + $0x30] sm:$0xff] %v1917_v21  ;;  %v1919_v57 = vpop.f32.mrb[5].mxu1 }
 0x2f3   : > { %2724 = vst [vmem:[%s4109_s4 + $0x38] sm:$0xff] %v1919_v57 }
 0x2f5   : > { %v1924_v29 = vpop.f32.mrb[6].mxu1 }
 0x2f6   : > { %2726 = vst [vmem:[%s4109_s4 + $0x48] sm:$0xff] %v1924_v29  ;;  %v1926_v60 = vpop.f32.mrb[7].mxu1 }
 0x2f7   : > { %2727 = vst [vmem:[%s4109_s4 + $0x50] sm:$0xff] %v1926_v60 }
 0x2f9   : > { %v1931_v10 = vpop.f32.mrb[8].mxu1 }
 0x2fa   : > { %2729 = vst [vmem:[%s4109_s4 + $0x60] sm:$0xff] %v1931_v10  ;;  %v1933_v0 = vpop.f32.mrb[9].mxu1 }
 0x2fb   : > { %2730 = vst [vmem:[%s4109_s4 + $0x68] sm:$0xff] %v1933_v0 }
 0x2fd   : > { %v1938_v2 = vpop.f32.mrb[10].mxu1 }
 0x2fe   : > { %2732 = vst [vmem:[%s4109_s4 + $0x78] sm:$0xff] %v1938_v2  ;;  %v1940_v18 = vpop.f32.mrb[11].mxu1 }
 0x2ff   : > { %2733 = vst [vmem:[%s4109_s4 + $0x80] sm:$0xff] %v1940_v18 }
 0x301   : > { %v1945_v4 = vpop.f32.mrb[12].mxu1  ;;  %2748 = sbr.rel (!%p3585_p5) target bundleno = 805 (0x325), region = 36 }
 0x302   : > { %2735 = vst [vmem:[%s4109_s4 + $0x90] sm:$0xff] %v1945_v4  ;;  %v1947_v11 = vpop.f32.mrb[13].mxu1 }
 0x303   : > { %2736 = vst [vmem:[%s4109_s4 + $0x98] sm:$0xff] %v1947_v11 }
 0x305   : > { %v1952_v22 = vpop.f32.mrb[14].mxu1 }
 0x306   : > { %2738 = vst [vmem:[%s4109_s4 + $0xa8] sm:$0xff] %v1952_v22  ;;  %v1954_v23 = vpop.f32.mrb[15].mxu1 }
 0x307   : > { %2739 = vst [vmem:[%s4109_s4 + $0xb0] sm:$0xff] %v1954_v23 }
 0x308   : > { %s4209_s6 = smov (!%p2751_p11, %s2750_s6), 8 }
 0x309   : > { %s4142_s7 = smul.u32 384, %s4209_s6 }
 0x30b   : > { %s2756_s8 = ssub.s32 3072, %s4142_s7 }
 0x30c   : > { %2757 = vsyncadd %s4137_s5, %s2756_s8  ;;  %p2834_p12 = scmp.ne.s32.totalorder %s4142_s7, 0  ;;  %s3385_s9 = smul.u32 3072, %s3568_s16 }
 0x30d   : > { %s2763_s10 = sshll.u32 %s4109_s4, 4  ;;  %s3524_s19 = smov [#allocation2]   ;;  %s4154_s10 = int_to_ptr.vmem [resolvable:$true] %s2763_s10 }
 0x30e   : > { %s4152_s17 = scalar_lea.hbm %s4201_s3, %s3385_s9  ;;  %s3459_s28 = scalar_lea.vmem %s4154_s10, %s4142_s7 }
 0x30f   : > { %p3460_p13 = scmp.ne.s32.totalorder %s4154_s10, %s3459_s28  ;;  %s3463_s20 = sshll.u32 %s3524_s19, 4  ;;  %s3464_s20 = int_to_ptr.vmem [resolvable:$false] %s3463_s20 }
 0x310   : > { %s3465_s16 = scalar_lea.vmem %s3464_s20, 6144  ;;  %p3466_p2 = scmp.lt.s32.totalorder %s4154_s10, %s3464_s20 }
 0x311   : > { %p3461_p0 = pnand %p3460_p13, %p2834_p12  ;;  %p3467_p3 = scmp.lt.s32.totalorder %s3465_s16, %s3459_s28 }
 0x313   : > { %p3462_p1 = pneg %p3461_p0  ;;  %p3468_p4 = por %p3467_p3, %p3466_p2 }
 0x315   : > { %p3469_p5 = pnand %p3468_p4, %p3462_p1 }
 0x317   : > { %3472 = shalt.err (!%p3469_p5)
}
 0x318   : > { %s3473_s24 = scalar_lea.hbm %s4152_s17, %s4142_s7  ;;  %s3477_s27 = scalar_lea.hbm %s4201_s3, 7296 }
 0x319   : > { %p3474_p7 = scmp.ne.s32.totalorder %s4152_s17, %s3473_s24  ;;  %p3478_p10 = scmp.lt.u32.totalorder %s4152_s17, %s4201_s3 }
 0x31a   : > { %p3479_p11 = scmp.lt.u32.totalorder %s3477_s27, %s3473_s24  ;;  %p3481_p0 = scmp.lt.u32.totalorder %s3473_s24, %s4152_s17 }
 0x31b   : > { %p3475_p8 = pnand %p3474_p7, %p2834_p12 }
 0x31c   : > { %p3480_p13 = por %p3479_p11, %p3478_p10 }
 0x31d   : > { %p3476_p9 = pneg %p3475_p8 }
 0x31e   : > { %p3482_p1 = por %p3481_p0, %p3480_p13 }
 0x320   : > { %p3483_p2 = pnand %p3482_p1, %p3476_p9 }
 0x322   : > { %3486 = shalt.err (!%p3483_p2)
}
 0x323   : > { %s3525_s4 = smov 384   ;;  %s3526_s6 = smov 24  }
 0x324   : > { %2769 = dma.vmem_to_hbm [thread:$0]  (%p2834_p12), %s4154_s10, %s4142_s7, %s4152_s17, %s4137_s5, %s3525_s4, %s3525_s4, %s3526_s6  }
 0x325 PF: > { %p3391_p3 = scmp.ge.s32.totalorder %s3521_s15, 2  ;;  %s2778_s8 = sand.u32 1, %s3509_s12  }
 0x326   : > { %s2779_s9 = scalar_lea.sflag [#allocation3], %s2778_s8 }
 0x327   : > { %p3388_p4 = pnand %p3391_p3, %p3589_p6 }
 0x329   : > { %3504 = dma.done.wait (!%p3388_p4), %s2779_s9, 3072  }
 0x32a   : > { %3506 = vsyncadd (!%p3388_p4), %s2779_s9, 4294964224  ;;  %p13_p5 = scmp.ge.s32.totalorder %s3572_s18, 5   ;;  %s4204_s12 = smov %s3513_s13 }
 0x32b   : > { %s4205_s13 = smov %s3517_s14  ;;  %s4206_s14 = smov %s3583_s21 }
 0x32c   : > { %s4207_s15 = smov %s3572_s18  ;;  %15 = sbr.rel (!%p13_p5) target bundleno = 3 (0x3), region = 67 }
 0x333   :  { %2784 = vsyncpa [#allocation3], 1 }
 0x334   :  { %2786 = vsyncpa [#allocation3 + $0x1], 1 }

</bundles_post_ra>
